<compile_context>
chip_gen: v5e
topology: v5e:2x2
jax: 0.10.0
libtpu: 0.0.40
codegen_flags: <defaults>
</compile_context>

<pallas_src>
import functools

import jax
import jax.numpy as jnp
from jax.experimental import pallas as pl
from jax.experimental.pallas import tpu as pltpu


def _conv_bn_relu_kernel(x_ref, w_ref, bias_ref, out_ref, *, taps, img_w, p_out):
    """One grid step = one image.

    x_ref   : (1, Cp, HWp)      bf16  flattened, zero-padded image frame
    w_ref   : (KH*KW, OCp, Cp)  bf16  per-tap weights, BN scale pre-folded
    bias_ref: (OCp, 1)          f32   folded BN+conv bias
    out_ref : (1, OCp, Pout)    f32   full-frame conv output (cropped by wrapper)
    """
    acc = None
    for idx, (kh, kw) in enumerate(taps):
        off = kh * img_w + kw                       # static lane offset of this tap
        xs = x_ref[0, :, off:off + p_out]           # (Cp, Pout) shifted window
        contrib = jnp.dot(w_ref[idx], xs, preferred_element_type=jnp.float32)
        acc = contrib if acc is None else acc + contrib
    y = acc + bias_ref[...]                         # per-channel bias, lane-broadcast
    out_ref[0] = jnp.maximum(y, 0.0).astype(out_ref.dtype)


def basic_conv2d(x, weight, conv_bias, gamma, beta, running_mean, running_var,
                 *, eps=1e-5):
    """x: (N, C, H, W) f32; weight: (OC, C, KH, KW).  Returns (N, OC, OH, OW) f32."""
    N, C, H, W = x.shape
    OC, _, KH, KW = weight.shape
    OH, OW = H - KH + 1, W - KW + 1          # stride 1, VALID (nn.Conv2d defaults)

    # ---- fold BatchNorm (eval) + conv bias into per-channel scale / bias ----
    inv_std = 1.0 / jnp.sqrt(running_var.astype(jnp.float32) + eps)
    scale = gamma.astype(jnp.float32) * inv_std                       # (OC,)
    bias = (beta.astype(jnp.float32)
            + (conv_bias.astype(jnp.float32) - running_mean.astype(jnp.float32)) * scale)

    # ---- padded layout constants ----
    OCp = pl.cdiv(OC, 8) * 8                  # f32 sublane multiple (8 -> 8: no waste)
    Cp = pl.cdiv(C, 16) * 16                  # bf16 sublane multiple
    max_off = (KH - 1) * W + (KW - 1)         # largest in-frame tap shift
    Pout = pl.cdiv(H * W, 128) * 128          # lane-dense output frame per image
    HWp = pl.cdiv(Pout + max_off, 128) * 128  # input frame incl. halo for shifts

    # ---- weights: fold BN scale in f32, reorder to (KH*KW, OCp, Cp), cast bf16 ----
    w_f = weight.astype(jnp.float32) * scale[:, None, None, None]     # (OC, C, KH, KW)
    w_f = w_f.transpose(2, 3, 0, 1).reshape(KH * KW, OC, C)           # tap-major
    w_p = jnp.zeros((KH * KW, OCp, Cp), jnp.bfloat16).at[:, :OC, :C].set(
        w_f.astype(jnp.bfloat16))

    bias_p = jnp.zeros((OCp, 1), jnp.float32).at[:OC, 0].set(bias)

    # ---- input: (N, C, H*W) flatten (free reshape), pad channels + halo, bf16 ----
    x_p = jnp.zeros((N, Cp, HWp), jnp.bfloat16).at[:, :C, :H * W].set(
        x.reshape(N, C, H * W).astype(jnp.bfloat16))

    taps = tuple((kh, kw) for kh in range(KH) for kw in range(KW))
    kernel = functools.partial(_conv_bn_relu_kernel, taps=taps, img_w=W, p_out=Pout)

    out_p = pl.pallas_call(
        kernel,
        out_shape=jax.ShapeDtypeStruct((N, OCp, Pout), jnp.float32),
        grid_spec=pltpu.PrefetchScalarGridSpec(
            num_scalar_prefetch=0,
            grid=(N,),
            in_specs=[
                pl.BlockSpec((1, Cp, HWp), lambda n: (n, 0, 0)),          # image frame
                pl.BlockSpec((KH * KW, OCp, Cp), lambda n: (0, 0, 0)),    # weights (resident)
                pl.BlockSpec((OCp, 1), lambda n: (0, 0)),                 # bias (resident)
            ],
            out_specs=pl.BlockSpec((1, OCp, Pout), lambda n: (n, 0, 0)),
        ),
        compiler_params=pltpu.CompilerParams(dimension_semantics=("parallel",)),
    )(x_p, w_p, bias_p)

    # Full-frame result -> crop to valid conv window.  Already NCHW: the only
    # post-processing is a trailing-dim slice (no lane/sublane transpose).
    out = out_p[:, :OC, :H * W].reshape(N, OC, H, W)[:, :, :OH, :OW]
    return out.astype(x.dtype)


if __name__ == "__main__":
    # Module config: BasicConv2d(input_channels=4, output_channels=8, kernel_size=3)
    N, C, H, W = 2, 4, 16, 16
    OC, KH, KW = 8, 3, 3

    key = jax.random.PRNGKey(0)
    kx, kwt, kb, kg, kbeta, km, kv = jax.random.split(key, 7)

    x = jax.random.normal(kx, (N, C, H, W), dtype=jnp.float32)
    weight = jax.random.normal(kwt, (OC, C, KH, KW), dtype=jnp.float32) * 0.1
    conv_bias = jax.random.normal(kb, (OC,), dtype=jnp.float32) * 0.1
    gamma = 1.0 + 0.1 * jax.random.normal(kg, (OC,), dtype=jnp.float32)
    beta = 0.1 * jax.random.normal(kbeta, (OC,), dtype=jnp.float32)
    running_mean = 0.1 * jax.random.normal(km, (OC,), dtype=jnp.float32)
    running_var = 1.0 + 0.1 * jax.random.uniform(kv, (OC,), dtype=jnp.float32)

    out = basic_conv2d(x, weight, conv_bias, gamma, beta,
                       running_mean, running_var)
    jax.block_until_ready(out)

    # Reference (plain JAX, f32) guards the tap ordering, BN fold, and cropping.
    ref = jax.lax.conv_general_dilated(
        x, weight, window_strides=(1, 1), padding="VALID",
        dimension_numbers=("NCHW", "OIHW", "NCHW"))
    inv_std = 1.0 / jnp.sqrt(running_var + 1e-5)
    ref = (ref + conv_bias[None, :, None, None] - running_mean[None, :, None, None]) \
        * (gamma * inv_std)[None, :, None, None] + beta[None, :, None, None]
    ref = jnp.maximum(ref, 0.0)

    assert out.shape == (N, OC, H - KH + 1, W - KW + 1)
    # bf16 MXU inputs with f32 accumulation -> loosened tolerance vs pure-f32 ref.
    assert jnp.allclose(out, ref, atol=2e-2, rtol=2e-2), \
        float(jnp.max(jnp.abs(out - ref)))

    print("KERNEL_OK")
</pallas_src>

<mosaic_0001>
module attributes {stable_mosaic.version = 11 : i64} {
  func.func @_conv_bn_relu_kernel(%arg0: i32, %arg1: memref<1x16x384xbf16, #tpu.memory_space<vmem>>, %arg2: memref<9x8x16xbf16, #tpu.memory_space<vmem>>, %arg3: memref<8x1xf32, #tpu.memory_space<vmem>>, %arg4: memref<1x8x256xf32, #tpu.memory_space<vmem>>) attributes {dimension_semantics = [#tpu.dimension_semantics<parallel>], iteration_bounds = array<i64: 2>, scalar_prefetch = 0 : i64, scratch_operands = 0 : i64, tpu.core_type = #tpu.core_type<tc>, window_params = [{transform_indices = @transform_0, window_bounds = array<i64: 1, 16, 384>}, {pipeline_mode = #tpu.pipeline_mode<synchronous>, transform_indices = @transform_1, window_bounds = array<i64: 9, 8, 16>}, {pipeline_mode = #tpu.pipeline_mode<synchronous>, transform_indices = @transform_2, window_bounds = array<i64: 8, 1>}, {transform_indices = @transform_3, window_bounds = array<i64: 1, 8, 256>}]} {
    %c0 = arith.constant 0 : index
    %c0_0 = arith.constant 0 : index
    %c0_1 = arith.constant 0 : index
    %0 = vector.load %arg1[%c0, %c0_0, %c0_1] : memref<1x16x384xbf16, #tpu.memory_space<vmem>>, vector<1x16x256xbf16>
    %1 = vector.shape_cast %0 : vector<1x16x256xbf16> to vector<16x256xbf16>
    %c0_2 = arith.constant 0 : index
    %c0_3 = arith.constant 0 : index
    %c0_4 = arith.constant 0 : index
    %2 = vector.load %arg2[%c0_2, %c0_3, %c0_4] : memref<9x8x16xbf16, #tpu.memory_space<vmem>>, vector<1x8x16xbf16>
    %3 = vector.shape_cast %2 : vector<1x8x16xbf16> to vector<8x16xbf16>
    %cst = arith.constant dense<0.000000e+00> : vector<8x256xf32>
    %4 = tpu.matmul %3, %1, %cst {dimension_numbers = #tpu.dot_dimension_numbers<[1], [0], [0], [1], [0, 0, 1, 1], [], []>} : vector<8x16xbf16>, vector<16x256xbf16>, vector<8x256xf32> -> vector<8x256xf32>
    %c0_5 = arith.constant 0 : index
    %c0_6 = arith.constant 0 : index
    %c1 = arith.constant 1 : index
    %5 = vector.load %arg1[%c0_5, %c0_6, %c1] : memref<1x16x384xbf16, #tpu.memory_space<vmem>>, vector<1x16x256xbf16>
    %6 = vector.shape_cast %5 : vector<1x16x256xbf16> to vector<16x256xbf16>
    %c1_7 = arith.constant 1 : index
    %c0_8 = arith.constant 0 : index
    %c0_9 = arith.constant 0 : index
    %7 = vector.load %arg2[%c1_7, %c0_8, %c0_9] : memref<9x8x16xbf16, #tpu.memory_space<vmem>>, vector<1x8x16xbf16>
    %8 = vector.shape_cast %7 : vector<1x8x16xbf16> to vector<8x16xbf16>
    %cst_10 = arith.constant dense<0.000000e+00> : vector<8x256xf32>
    %9 = tpu.matmul %8, %6, %cst_10 {dimension_numbers = #tpu.dot_dimension_numbers<[1], [0], [0], [1], [0, 0, 1, 1], [], []>} : vector<8x16xbf16>, vector<16x256xbf16>, vector<8x256xf32> -> vector<8x256xf32>
    %10 = arith.addf %4, %9 : vector<8x256xf32>
    %c0_11 = arith.constant 0 : index
    %c0_12 = arith.constant 0 : index
    %c2 = arith.constant 2 : index
    %11 = vector.load %arg1[%c0_11, %c0_12, %c2] : memref<1x16x384xbf16, #tpu.memory_space<vmem>>, vector<1x16x256xbf16>
    %12 = vector.shape_cast %11 : vector<1x16x256xbf16> to vector<16x256xbf16>
    %c2_13 = arith.constant 2 : index
    %c0_14 = arith.constant 0 : index
    %c0_15 = arith.constant 0 : index
    %13 = vector.load %arg2[%c2_13, %c0_14, %c0_15] : memref<9x8x16xbf16, #tpu.memory_space<vmem>>, vector<1x8x16xbf16>
    %14 = vector.shape_cast %13 : vector<1x8x16xbf16> to vector<8x16xbf16>
    %cst_16 = arith.constant dense<0.000000e+00> : vector<8x256xf32>
    %15 = tpu.matmul %14, %12, %cst_16 {dimension_numbers = #tpu.dot_dimension_numbers<[1], [0], [0], [1], [0, 0, 1, 1], [], []>} : vector<8x16xbf16>, vector<16x256xbf16>, vector<8x256xf32> -> vector<8x256xf32>
    %16 = arith.addf %10, %15 : vector<8x256xf32>
    %c0_17 = arith.constant 0 : index
    %c0_18 = arith.constant 0 : index
    %c16 = arith.constant 16 : index
    %17 = vector.load %arg1[%c0_17, %c0_18, %c16] : memref<1x16x384xbf16, #tpu.memory_space<vmem>>, vector<1x16x256xbf16>
    %18 = vector.shape_cast %17 : vector<1x16x256xbf16> to vector<16x256xbf16>
    %c3 = arith.constant 3 : index
    %c0_19 = arith.constant 0 : index
    %c0_20 = arith.constant 0 : index
    %19 = vector.load %arg2[%c3, %c0_19, %c0_20] : memref<9x8x16xbf16, #tpu.memory_space<vmem>>, vector<1x8x16xbf16>
    %20 = vector.shape_cast %19 : vector<1x8x16xbf16> to vector<8x16xbf16>
    %cst_21 = arith.constant dense<0.000000e+00> : vector<8x256xf32>
    %21 = tpu.matmul %20, %18, %cst_21 {dimension_numbers = #tpu.dot_dimension_numbers<[1], [0], [0], [1], [0, 0, 1, 1], [], []>} : vector<8x16xbf16>, vector<16x256xbf16>, vector<8x256xf32> -> vector<8x256xf32>
    %22 = arith.addf %16, %21 : vector<8x256xf32>
    %c0_22 = arith.constant 0 : index
    %c0_23 = arith.constant 0 : index
    %c17 = arith.constant 17 : index
    %23 = vector.load %arg1[%c0_22, %c0_23, %c17] : memref<1x16x384xbf16, #tpu.memory_space<vmem>>, vector<1x16x256xbf16>
    %24 = vector.shape_cast %23 : vector<1x16x256xbf16> to vector<16x256xbf16>
    %c4 = arith.constant 4 : index
    %c0_24 = arith.constant 0 : index
    %c0_25 = arith.constant 0 : index
    %25 = vector.load %arg2[%c4, %c0_24, %c0_25] : memref<9x8x16xbf16, #tpu.memory_space<vmem>>, vector<1x8x16xbf16>
    %26 = vector.shape_cast %25 : vector<1x8x16xbf16> to vector<8x16xbf16>
    %cst_26 = arith.constant dense<0.000000e+00> : vector<8x256xf32>
    %27 = tpu.matmul %26, %24, %cst_26 {dimension_numbers = #tpu.dot_dimension_numbers<[1], [0], [0], [1], [0, 0, 1, 1], [], []>} : vector<8x16xbf16>, vector<16x256xbf16>, vector<8x256xf32> -> vector<8x256xf32>
    %28 = arith.addf %22, %27 : vector<8x256xf32>
    %c0_27 = arith.constant 0 : index
    %c0_28 = arith.constant 0 : index
    %c18 = arith.constant 18 : index
    %29 = vector.load %arg1[%c0_27, %c0_28, %c18] : memref<1x16x384xbf16, #tpu.memory_space<vmem>>, vector<1x16x256xbf16>
    %30 = vector.shape_cast %29 : vector<1x16x256xbf16> to vector<16x256xbf16>
    %c5 = arith.constant 5 : index
    %c0_29 = arith.constant 0 : index
    %c0_30 = arith.constant 0 : index
    %31 = vector.load %arg2[%c5, %c0_29, %c0_30] : memref<9x8x16xbf16, #tpu.memory_space<vmem>>, vector<1x8x16xbf16>
    %32 = vector.shape_cast %31 : vector<1x8x16xbf16> to vector<8x16xbf16>
    %cst_31 = arith.constant dense<0.000000e+00> : vector<8x256xf32>
    %33 = tpu.matmul %32, %30, %cst_31 {dimension_numbers = #tpu.dot_dimension_numbers<[1], [0], [0], [1], [0, 0, 1, 1], [], []>} : vector<8x16xbf16>, vector<16x256xbf16>, vector<8x256xf32> -> vector<8x256xf32>
    %34 = arith.addf %28, %33 : vector<8x256xf32>
    %c0_32 = arith.constant 0 : index
    %c0_33 = arith.constant 0 : index
    %c32 = arith.constant 32 : index
    %35 = vector.load %arg1[%c0_32, %c0_33, %c32] : memref<1x16x384xbf16, #tpu.memory_space<vmem>>, vector<1x16x256xbf16>
    %36 = vector.shape_cast %35 : vector<1x16x256xbf16> to vector<16x256xbf16>
    %c6 = arith.constant 6 : index
    %c0_34 = arith.constant 0 : index
    %c0_35 = arith.constant 0 : index
    %37 = vector.load %arg2[%c6, %c0_34, %c0_35] : memref<9x8x16xbf16, #tpu.memory_space<vmem>>, vector<1x8x16xbf16>
    %38 = vector.shape_cast %37 : vector<1x8x16xbf16> to vector<8x16xbf16>
    %cst_36 = arith.constant dense<0.000000e+00> : vector<8x256xf32>
    %39 = tpu.matmul %38, %36, %cst_36 {dimension_numbers = #tpu.dot_dimension_numbers<[1], [0], [0], [1], [0, 0, 1, 1], [], []>} : vector<8x16xbf16>, vector<16x256xbf16>, vector<8x256xf32> -> vector<8x256xf32>
    %40 = arith.addf %34, %39 : vector<8x256xf32>
    %c0_37 = arith.constant 0 : index
    %c0_38 = arith.constant 0 : index
    %c33 = arith.constant 33 : index
    %41 = vector.load %arg1[%c0_37, %c0_38, %c33] : memref<1x16x384xbf16, #tpu.memory_space<vmem>>, vector<1x16x256xbf16>
    %42 = vector.shape_cast %41 : vector<1x16x256xbf16> to vector<16x256xbf16>
    %c7 = arith.constant 7 : index
    %c0_39 = arith.constant 0 : index
    %c0_40 = arith.constant 0 : index
    %43 = vector.load %arg2[%c7, %c0_39, %c0_40] : memref<9x8x16xbf16, #tpu.memory_space<vmem>>, vector<1x8x16xbf16>
    %44 = vector.shape_cast %43 : vector<1x8x16xbf16> to vector<8x16xbf16>
    %cst_41 = arith.constant dense<0.000000e+00> : vector<8x256xf32>
    %45 = tpu.matmul %44, %42, %cst_41 {dimension_numbers = #tpu.dot_dimension_numbers<[1], [0], [0], [1], [0, 0, 1, 1], [], []>} : vector<8x16xbf16>, vector<16x256xbf16>, vector<8x256xf32> -> vector<8x256xf32>
    %46 = arith.addf %40, %45 : vector<8x256xf32>
    %c0_42 = arith.constant 0 : index
    %c0_43 = arith.constant 0 : index
    %c34 = arith.constant 34 : index
    %47 = vector.load %arg1[%c0_42, %c0_43, %c34] : memref<1x16x384xbf16, #tpu.memory_space<vmem>>, vector<1x16x256xbf16>
    %48 = vector.shape_cast %47 : vector<1x16x256xbf16> to vector<16x256xbf16>
    %c8 = arith.constant 8 : index
    %c0_44 = arith.constant 0 : index
    %c0_45 = arith.constant 0 : index
    %49 = vector.load %arg2[%c8, %c0_44, %c0_45] : memref<9x8x16xbf16, #tpu.memory_space<vmem>>, vector<1x8x16xbf16>
    %50 = vector.shape_cast %49 : vector<1x8x16xbf16> to vector<8x16xbf16>
    %cst_46 = arith.constant dense<0.000000e+00> : vector<8x256xf32>
    %51 = tpu.matmul %50, %48, %cst_46 {dimension_numbers = #tpu.dot_dimension_numbers<[1], [0], [0], [1], [0, 0, 1, 1], [], []>} : vector<8x16xbf16>, vector<16x256xbf16>, vector<8x256xf32> -> vector<8x256xf32>
    %52 = arith.addf %46, %51 : vector<8x256xf32>
    %c0_47 = arith.constant 0 : index
    %c0_48 = arith.constant 0 : index
    %53 = vector.load %arg3[%c0_47, %c0_48] : memref<8x1xf32, #tpu.memory_space<vmem>>, vector<8x1xf32>
    %54 = vector.broadcast %53 : vector<8x1xf32> to vector<8x256xf32>
    %55 = arith.addf %52, %54 : vector<8x256xf32>
    %cst_49 = arith.constant 0.000000e+00 : f32
    %56 = vector.broadcast %cst_49 : f32 to vector<8x256xf32>
    %57 = arith.maximumf %55, %56 : vector<8x256xf32>
    %c0_50 = arith.constant 0 : index
    %c0_51 = arith.constant 0 : index
    %c0_52 = arith.constant 0 : index
    %58 = vector.load %arg4[%c0_50, %c0_51, %c0_52] : memref<1x8x256xf32, #tpu.memory_space<vmem>>, vector<1x8x256xf32>
    %59 = vector.shape_cast %58 : vector<1x8x256xf32> to vector<8x256xf32>
    %60 = vector.shape_cast %57 : vector<8x256xf32> to vector<1x8x256xf32>
    tpu.vector_store %arg4[%c0_50, %c0_51, %c0_52], %60 {strides = array<i32>} : memref<1x8x256xf32, #tpu.memory_space<vmem>>, vector<1x8x256xf32>,
    return
  }
  func.func @transform_0(%arg0: i32) -> (i32, i32, i32) {
    %c0_i32 = arith.constant 0 : i32
    %c0_i32_0 = arith.constant 0 : i32
    %c0_i32_1 = arith.constant 0 : i32
    return %arg0, %c0_i32, %c0_i32_0 : i32, i32, i32
  }
  func.func @transform_1(%arg0: i32) -> (i32, i32, i32) {
    %c0_i32 = arith.constant 0 : i32
    %c0_i32_0 = arith.constant 0 : i32
    %c0_i32_1 = arith.constant 0 : i32
    %c0_i32_2 = arith.constant 0 : i32
    return %c0_i32, %c0_i32_0, %c0_i32_1 : i32, i32, i32
  }
  func.func @transform_2(%arg0: i32) -> (i32, i32) {
    %c0_i32 = arith.constant 0 : i32
    %c0_i32_0 = arith.constant 0 : i32
    %c0_i32_1 = arith.constant 0 : i32
    return %c0_i32, %c0_i32_0 : i32, i32
  }
  func.func @transform_3(%arg0: i32) -> (i32, i32, i32) {
    %c0_i32 = arith.constant 0 : i32
    %c0_i32_0 = arith.constant 0 : i32
    %c0_i32_1 = arith.constant 0 : i32
    return %arg0, %c0_i32, %c0_i32_0 : i32, i32, i32
  }
}

</mosaic_0001>

<bundles_post_ra>
// kernel: tpu_custom_call.1
= control target key start
LH: loop header
LB: loop body
LE: loop exit
PB: predicated region body
PF: predicated region fallthrough
CT: control target
= control target key end

     0   :  { %8 = vsyncpa [#allocation3], 0  ;;  %s1197_s0 = inlined_call_operand.hbm [shape: bf16[2,16,384], index: 0, kind: input, shape index: {}]   ;;  %s1198_s1 = inlined_call_operand.hbm [shape: bf16[9,8,16], index: 1, kind: input, shape index: {}]   ;;  %s1199_s2 = inlined_call_operand.vmem [shape: f32[8,1], index: 2, kind: input, shape index: {}]   ;;  %s1200_s3 = inlined_call_operand.hbm [shape: f32[2,8,256], index: 3, kind: output, shape index: {}]  }
   0x1   :  { %10 = vsyncpa [#allocation3 + $0x1], 0 }
   0x2   :  { %11 = vsyncpa [#allocation6], 0 }
   0x3   :  { %12 = vsyncpa [#allocation4], 0 }
   0x4   :  { %14 = vsyncpa [#allocation4 + $0x1], 0  ;;  %s1025_s12 = smov 0   ;;  %s1027_s13 = smov 0  }
   0x5   :  { %s1029_s14 = smov 0   ;;  %s1031_s15 = smov 0  }
   0x6 LB: > { %s1046_s16 = sadd.s32 4294967295, %s989_s15   ;;  %s728_s17 = sadd.s32 4294967294, %s989_s15   ;;  %s989_s15 = sphi %s1031_s15, %s1210_s15   ;;  %s985_s14 = sphi %s1029_s14, %s1209_s14   ;;  %s981_s13 = sphi %s1027_s13, %s1208_s13   ;;  %s977_s12 = sphi %s1025_s12, %s1207_s12  }
   0x7   : > { %p40_p0 = scmp.ne.s32.totalorder %s981_s13, %s977_s12  ;;  %p41_p1 = scmp.eq.s32.totalorder %s1046_s16, 0 }
   0x8   : > { %p106_p2 = scmp.eq.s32.totalorder %s1046_s16, 1  ;;  %p112_p3 = scmp.eq.s32.totalorder %s728_s17, 1 }
   0x9   : > { %p1055_p4 = por %p41_p1, %p40_p0  ;;  %p729_p5 = scmp.ge.s32.totalorder %s989_s15, 1 }
   0xa   : > { %p1060_p6 = por %p112_p3, %p40_p0  ;;  %p119_p7 = scmp.lt.s32.totalorder %s989_s15, 3 }
   0xb   : > { %s130_s22 = sshll.u32 %s1198_s1, 4  ;;  %s991_s24 = smov [#allocation5]   ;;  %s131_s22 = int_to_ptr.hbm [resolvable:$true] %s130_s22 }
   0xc   : > { %p1068_p8 = pnand %p729_p5, %p119_p7  ;;  %s132_s25 = sshll.u32 %s991_s24, 4  ;;  %s133_s25 = int_to_ptr.vmem [resolvable:$true] %s132_s25 }
   0xd   : > { %s1078_s26 = sadd.s32 1, %s989_s15   ;;  %s992_s27 = smov 64  }
   0xe   : > { %p796_p9 = pneg %p1068_p8  ;;  %s993_s28 = smov 4  }
   0xf   : > { %s24_s29 = ssub.s32 %s989_s15, %s1078_s26  ;;  %s27_s30 = sadd.s32 1, %s985_s14 }
  0x10   : > { %p797_p10 = pnand %p796_p9, %p41_p1  ;;  %p25_p12 = scmp.eq.s32.totalorder %s24_s29, 0 }
  0x11   : > { %p34_p13 = scmp.ne.s32.totalorder %s985_s14, %s981_s13  ;;  %p35_p0 = scmp.eq.s32.totalorder %s989_s15, 0 }
  0x12   : > { %799 = dma.hbm_to_vmem [thread:$0]  (!%p797_p10), %s131_s22, 576, %s133_s25, [#allocation6], %s992_s27, %s992_s27, %s993_s28  }
  0x13   : > { %p809_p3 = scmp.lt.s32.totalorder %s989_s15, 2  ;;  %p36_p5 = por %p35_p0, %p34_p13 }
  0x14   : > { %s1088_s4 = scalar_select %p25_p12, %s985_s14, %s27_s30  }
  0x15   : > { %p1092_p7 = por %p106_p2, %p34_p13  ;;  %s149_s6 = sand.u32 1, %s985_s14  }
  0x16   : > { %s786_s7 = smul.u32 24, %s989_s15  ;;  %p1101_p9 = pnand %p809_p3, %p36_p5 }
  0x17   : > { %s785_s8 = smul.u32 24, %s149_s6  ;;  %s150_s24 = scalar_lea.sflag [#allocation3], %s149_s6 }
  0x18   : > { %s158_s11 = scalar_lea.hbm %s1197_s0, %s786_s7  ;;  %p893_p10 = pneg %p1101_p9 }
  0x19   : > { %s159_s20 = sshll.u32 %s158_s11, 4  ;;  %s153_s21 = scalar_lea.vmem [#allocation2], %s785_s8  ;;  %s160_s20 = int_to_ptr.hbm [resolvable:$true] %s159_s20 }
  0x1a   : > { %s161_s22 = sshll.u32 %s153_s21, 4  ;;  %s889_s25 = sshra.s32 %s160_s20, 4  ;;  %s162_s22 = int_to_ptr.vmem [resolvable:$true] %s161_s22  ;;  %s890_s25 = int_to_ptr.hbm [resolvable:$true] %s889_s25 }
  0x1b   : > { %s891_s27 = scalar_lea.hbm %s890_s25, 24  ;;  %s896_s30 = scalar_lea.hbm %s1197_s0, 48 }
  0x1c   : > { %p892_p2 = scmp.ne.s32.totalorder %s890_s25, %s891_s27  ;;  %p897_p0 = scmp.lt.s32.totalorder %s890_s25, %s1197_s0 }
  0x1d   : > { %p898_p3 = scmp.lt.s32.totalorder %s896_s30, %s891_s27 }
  0x1e   : > { %p894_p12 = pnand %p893_p10, %p892_p2 }
  0x1f   : > { %p899_p5 = por %p898_p3, %p897_p0 }
  0x20   : > { %p895_p13 = pneg %p894_p12 }
  0x22   : > { %p900_p11 = pnand %p899_p5, %p895_p13 }
  0x24   : > { %903 = shalt.err (!%p900_p11)
}
  0x25   : > { %s994_s6 = smov 192   ;;  %s995_s8 = smov 12  }
  0x26   : > { %803 = dma.hbm_to_vmem [thread:$0]  (!%p1101_p9), %s160_s20, 384, %s162_s22, %s150_s24, %s994_s6, %s994_s6, %s995_s8  }
  0x27   : > { %173 = sbr.rel (%p1068_p8) target bundleno = 378 (0x17a), region = 32  ;;  %s1118_s10 = sand.u32 (!%p1068_p8), 1, %s981_s13  }
  0x28   : > { %s787_s11 = smul.u32 (!%p1068_p8), 24, %s1118_s10  ;;  %s176_s21 = scalar_lea.sflag (!%p1068_p8), [#allocation3], %s1118_s10 }
  0x2a   : > { %s1122_s25 = scalar_lea.vmem (!%p1068_p8), [#allocation2], %s787_s11 }
  0x2c   : > { %964 = dma.done.wait (%p1055_p4), %s176_s21, 384  }
  0x2d   : > { %966 = vsyncadd (%p1055_p4), %s176_s21, 4294966912 }
  0x2e   : > { %968 = dma.done.wait (%p41_p1), [#allocation6], 576  }
  0x2f   : > { %970 = vsyncadd (%p41_p1), [#allocation6], 4294966720  ;;  %v746_v0 = vld [vmem:[%s1122_s25 + $0x8] sm:$0xf]  ;;  %v783_v1 = vld [vmem:[%s1122_s25 + $0x10] sm:$0xf0] }
  0x30   : > { %v738_v2 = vld [vmem:[%s1122_s25] sm:$0xf]  ;;  %v747_v3 = vor.u32 %v783_v1, %v746_v0  ;;  %v782_v4 = vld [vmem:[%s1122_s25 + $0x8] sm:$0xf0]  ;;  %v781_v5 = vld [vmem:[%s1122_s25 + $0x4] sm:$0xf] }
  0x31   : > { %v740_v6 = vld [vmem:[%s1122_s25 + $0xc] sm:$0xf0]  ;;  %v739_v7 = vor.u32 %v782_v4, %v738_v2  ;;  %s996_s18 = smov 127   ;;  %s997_s23 = smov 126   ;;  %v752_v9 = vld [vmem:[%s1122_s25] sm:$0xf] }
  0x32   : > { %v743_v8 = vor.u32 %v781_v5, %v740_v6  ;;  %235 = vrot.lane.b32.xlu1 %v747_v3, %s996_s18  ;;  %s998_s17 = smov 112   ;;  %s999_s20 = smov 111   ;;  %v780_v10 = vld [vmem:[%s1122_s25 + $0x8] sm:$0xf0]  ;;  %v779_v11 = vld [vmem:[%s1122_s25 + $0x4] sm:$0xf] }
  0x33   : > { %231 = vrot.lane.b32.xlu0 %v739_v7, %s996_s18  ;;  %s1000_s22 = smov 110   ;;  %s1001_s24 = smov 96   ;;  %v753_v12 = vor.u32 %v780_v10, %v752_v9  ;;  %v754_v13 = vld [vmem:[%s1122_s25 + $0xc] sm:$0xf0]  ;;  %vm242_vm0 = vcmask 130048   ;;  %vm319_vm1 = vcmask 1031168  }
  0x34   : > { %315 = vrot.lane.b32.xlu2 %v743_v8, %s997_s23  ;;  %s1002_s27 = smov 95   ;;  %s1003_s28 = smov 94   ;;  %v757_v14 = vor.u32 %v779_v11, %v754_v13  ;;  %v211_v15 = vld [vmem:[#allocation5] sm:$0xf]  ;;  %vm237_vm2 = vcmask 1039360   ;;  %vm363_vm3 = vcmask 916480  }
  0x35   : > { %292 = vmatpush.bf16.msra.mxu2 %v753_v12  ;;  %v217_v27 = vld [vmem:[#allocation5 + $0x4] sm:$0xf]  ;;  %v356_v33 = vld [vmem:[#allocation5 + $0xc] sm:$0xf]  ;;  %vm407_vm4 = vcmask 908288   ;;  %vm451_vm5 = vcmask 900096  }
  0x36   : > { %305 = vmatpush.bf16.msra.mxu3 %v757_v14  ;;  %v312_v39 = vld [vmem:[#allocation5 + $0x8] sm:$0xf]  ;;  %v444_v44 = vld [vmem:[#allocation5 + $0x14] sm:$0xf]  ;;  %vm495_vm6 = vcmask 785408   ;;  %vm539_vm7 = vcmask 777216  }
  0x37   : > { %v400_v50 = vld [vmem:[#allocation5 + $0x10] sm:$0xf]  ;;  %v1004_v53 = vmov 0   ;;  %v532_v58 = vld [vmem:[#allocation5 + $0x1c] sm:$0xf]  ;;  %vm583_vm8 = vcmask 769024  }
  0x38   : > { %758 = vmatmul.msk.bf16.vlgmr.msra.gmra.mxu2 %vm242_vm0, %v211_v15  ;;  %v619_v52 = vld [vmem:[%s1199_s2] sm:$0xff]  ;;  %858 = vset.pattern.permute.xlu0 %v1004_v53  ;;  %v488_v0 = vld [vmem:[#allocation5 + $0x18] sm:$0xf]  ;;  %v576_v1 = vld [vmem:[#allocation5 + $0x20] sm:$0xf]  ;;  %s735_s7 = sshll.u32 %s1118_s10, 4 }
  0x39   : > { %759 = vmatmul.msk.bf16.vlgmr.msra.gmra.mxu3 %vm242_vm0, %v211_v15  ;;  %s784_s9 = sshll.u32 %s1046_s16, 4  ;;  %s207_s21 = scalar_lea.vmem [#allocation7], %s735_s7 }
  0x3a   : > { %313 = vrot.lane.b32.xlu1 %v739_v7, %s997_s23  ;;  %s643_s11 = scalar_lea.hbm %s1200_s3, %s784_s9  ;;  %s645_s25 = sshll.u32 %s207_s21, 4  ;;  %s646_s25 = int_to_ptr.vmem [resolvable:$true] %s645_s25 }
  0x3b   : > { %233 = vrot.lane.b32.xlu0 %v743_v8, %s996_s18  ;;  %s647_s18 = sshll.u32 %s643_s11, 4  ;;  %s632_s16 = scalar_lea.sflag [#allocation4], %s1118_s10  ;;  %s648_s18 = int_to_ptr.hbm [resolvable:$true] %s647_s18 }
  0x3c   : > { %317 = vrot.lane.b32.xlu2 %v747_v3, %s997_s23  ;;  %s933_s23 = sshra.s32 %s648_s18, 4  ;;  %s934_s23 = int_to_ptr.hbm [resolvable:$true] %s933_s23 }
  0x3d   : > { %p940_p11 = scmp.lt.s32.totalorder %s934_s23, %s1200_s3 }
  0x42   : > { %359 = vrot.lane.b32.xlu1 %v743_v8, %s998_s17 }
  0x43   : > { %357 = vrot.lane.b32.xlu0 %v739_v7, %s998_s17 }
  0x44   : > { %361 = vrot.lane.b32.xlu2 %v747_v3, %s998_s17  ;;  %s935_s17 = scalar_lea.hbm %s934_s23, 16 }
  0x45   : > { %p936_p1 = scmp.ne.s32.totalorder %s934_s23, %s935_s17 }
  0x47   : > { %p937_p4 = pnand %p936_p1, %p1092_p7 }
  0x49   : > { %p938_p8 = pneg %p937_p4 }
  0x4a   : > { %403 = vrot.lane.b32.xlu1 %v743_v8, %s999_s20 }
  0x4b   : > { %401 = vrot.lane.b32.xlu0 %v739_v7, %s999_s20 }
  0x4c   : > { %405 = vrot.lane.b32.xlu2 %v747_v3, %s999_s20 }
  0x52   : > { %447 = vrot.lane.b32.xlu1 %v743_v8, %s1000_s22 }
  0x53   : > { %445 = vrot.lane.b32.xlu0 %v739_v7, %s1000_s22 }
  0x54   : > { %449 = vrot.lane.b32.xlu2 %v747_v3, %s1000_s22 }
  0x5a   : > { %491 = vrot.lane.b32.xlu1 %v743_v8, %s1001_s24 }
  0x5b   : > { %489 = vrot.lane.b32.xlu0 %v739_v7, %s1001_s24 }
  0x5c   : > { %493 = vrot.lane.b32.xlu2 %v747_v3, %s1001_s24  ;;  %s939_s24 = scalar_lea.hbm %s1200_s3, 32 }
  0x5d   : > { %p941_p9 = scmp.lt.s32.totalorder %s939_s24, %s935_s17 }
  0x5f   : > { %p942_p2 = por %p941_p9, %p940_p11 }
  0x61   : > { %p943_p10 = pnand %p942_p2, %p938_p8 }
  0x62   : > { %535 = vrot.lane.b32.xlu1 %v743_v8, %s1002_s27 }
  0x63   : > { %533 = vrot.lane.b32.xlu0 %v739_v7, %s1002_s27 }
  0x64   : > { %537 = vrot.lane.b32.xlu2 %v747_v3, %s1002_s27 }
  0x6a   : > { %579 = vrot.lane.b32.xlu1 %v743_v8, %s1003_s28 }
  0x6b   : > { %577 = vrot.lane.b32.xlu0 %v739_v7, %s1003_s28 }
  0x6c   : > { %581 = vrot.lane.b32.xlu2 %v747_v3, %s1003_s28 }
  0x73   : > { %622 = vperm.xlu0 %858, %v619_v52  }
  0x8e   : > { %v316_v16 = vpop.permute.xlu2 %315 }
  0x96   : > { %v318_v17 = vpop.permute.xlu2 %317 }
  0x97   : > { %v321_v24 = vsel %vm319_vm1, %v316_v16, %v318_v17 }
  0x9e   : > { %v362_v20 = vpop.permute.xlu2 %361 }
  0xa4   : > { %v236_v18 = vpop.permute.xlu1 %235 }
  0xa5   : > { %v232_v19 = vpop.permute.xlu0 %231 }
  0xa6   : > { %v406_v29 = vpop.permute.xlu2 %405 }
  0xac   : > { %v314_v21 = vpop.permute.xlu1 %313 }
  0xad   : > { %v234_v22 = vpop.permute.xlu0 %233  ;;  %v320_v23 = vsel %vm319_vm1, %v314_v21, %v316_v16 }
  0xae   : > { %v238_v25 = vsel %vm237_vm2, %v232_v19, %v234_v22  ;;  %v239_v26 = vsel %vm237_vm2, %v234_v22, %v236_v18  ;;  %v450_v38 = vpop.permute.xlu2 %449 }
  0xaf   : > { %253 = vmatpush.bf16.msra.mxu0 %v238_v25  ;;  %266 = vmatpush.bf16.msra.mxu1 %v239_v26 }
  0xb2   : > { %748 = vmatmul.msk.bf16.vlgmr.msra.gmra.mxu0 %vm242_vm0, %v217_v27  ;;  %749 = vmatmul.msk.bf16.vlgmr.msra.gmra.mxu1 %vm242_vm0, %v217_v27 }
  0xb3   : > { %334 = vmatpush.bf16.msrb.mxu0 %v320_v23  ;;  %347 = vmatpush.bf16.msrb.mxu1 %v321_v24 }
  0xb4   : > { %v360_v28 = vpop.permute.xlu1 %359 }
  0xb5   : > { %v358_v30 = vpop.permute.xlu0 %357  ;;  %v365_v31 = vsel %vm363_vm3, %v360_v28, %v362_v20 }
  0xb6   : > { %v364_v32 = vsel %vm363_vm3, %v358_v30, %v360_v28  ;;  %391 = vmatpush.bf16.msrb.mxu3 %v365_v31  ;;  %v494_v45 = vpop.permute.xlu2 %493 }
  0xb7   : > { %378 = vmatpush.bf16.msrb.mxu2 %v364_v32 }
  0xb9   : > { %763 = vmatmul.msk.bf16.vlgmr.msrb.gmra.mxu3 %vm242_vm0, %v356_v33 }
  0xba   : > { %762 = vmatmul.msk.bf16.vlgmr.msrb.gmra.mxu2 %vm242_vm0, %v356_v33 }
  0xbb   : > { %v294_v2 = vpop.f32.mrf.mxu2 }
  0xbc   : > { %v404_v34 = vpop.permute.xlu1 %403  ;;  %v307_v3 = vpop.f32.mrf.mxu3 }
  0xbd   : > { %v409_v35 = vsel %vm407_vm4, %v404_v34, %v406_v29  ;;  %v402_v36 = vpop.permute.xlu0 %401 }
  0xbe   : > { %v408_v37 = vsel %vm407_vm4, %v402_v36, %v404_v34  ;;  %435 = vmatpush.bf16.msra.mxu1 %v409_v35  ;;  %v538_v51 = vpop.permute.xlu2 %537 }
  0xbf   : > { %422 = vmatpush.bf16.msra.mxu0 %v408_v37 }
  0xc2   : > { %760 = vmatmul.msk.bf16.vlgmr.msrb.gmra.mxu0 %vm242_vm0, %v312_v39  ;;  %761 = vmatmul.msk.bf16.vlgmr.msrb.gmra.mxu1 %vm242_vm0, %v312_v39 }
  0xc3   : > { %v296_v4 = vpop.f32.mrf.mxu2 }
  0xc4   : > { %v448_v40 = vpop.permute.xlu1 %447  ;;  %v309_v5 = vpop.f32.mrf.mxu3 }
  0xc5   : > { %v453_v41 = vsel %vm451_vm5, %v448_v40, %v450_v38  ;;  %v446_v42 = vpop.permute.xlu0 %445 }
  0xc6   : > { %v452_v43 = vsel %vm451_vm5, %v446_v42, %v448_v40  ;;  %479 = vmatpush.bf16.msra.mxu3 %v453_v41  ;;  %v582_v59 = vpop.permute.xlu2 %581 }
  0xc7   : > { %466 = vmatpush.bf16.msra.mxu2 %v452_v43 }
  0xc9   : > { %767 = vmatmul.msk.bf16.vlgmr.msra.gmra.mxu3 %vm242_vm0, %v444_v44 }
  0xca   : > { %766 = vmatmul.msk.bf16.vlgmr.msra.gmra.mxu2 %vm242_vm0, %v444_v44 }
  0xcc   : > { %v492_v46 = vpop.permute.xlu1 %491 }
  0xcd   : > { %v497_v47 = vsel %vm495_vm6, %v492_v46, %v494_v45  ;;  %v490_v48 = vpop.permute.xlu0 %489 }
  0xce   : > { %v496_v49 = vsel %vm495_vm6, %v490_v48, %v492_v46  ;;  %523 = vmatpush.bf16.msrb.mxu1 %v497_v47 }
  0xcf   : > { %510 = vmatpush.bf16.msrb.mxu0 %v496_v49 }
  0xd2   : > { %764 = vmatmul.msk.bf16.vlgmr.msra.gmra.mxu0 %vm242_vm0, %v400_v50  ;;  %765 = vmatmul.msk.bf16.vlgmr.msra.gmra.mxu1 %vm242_vm0, %v400_v50 }
  0xd4   : > { %v536_v54 = vpop.permute.xlu1 %535 }
  0xd5   : > { %v541_v55 = vsel %vm539_vm7, %v536_v54, %v538_v51  ;;  %v534_v56 = vpop.permute.xlu0 %533 }
  0xd6   : > { %v540_v57 = vsel %vm539_vm7, %v534_v56, %v536_v54  ;;  %567 = vmatpush.bf16.msrb.mxu3 %v541_v55 }
  0xd7   : > { %554 = vmatpush.bf16.msrb.mxu2 %v540_v57 }
  0xd9   : > { %771 = vmatmul.msk.bf16.vlgmr.msrb.gmra.mxu3 %vm242_vm0, %v532_v58 }
  0xda   : > { %770 = vmatmul.msk.bf16.vlgmr.msrb.gmra.mxu2 %vm242_vm0, %v532_v58 }
  0xdc   : > { %v580_v60 = vpop.permute.xlu1 %579 }
  0xdd   : > { %v585_v61 = vsel %vm583_vm8, %v580_v60, %v582_v59  ;;  %v578_v62 = vpop.permute.xlu0 %577 }
  0xde   : > { %v584_v63 = vsel %vm583_vm8, %v578_v62, %v580_v60  ;;  %611 = vmatpush.bf16.msra.mxu1 %v585_v61 }
  0xdf   : > { %598 = vmatpush.bf16.msra.mxu0 %v584_v63 }
  0xe2   : > { %768 = vmatmul.msk.bf16.vlgmr.msrb.gmra.mxu0 %vm242_vm0, %v488_v0  ;;  %769 = vmatmul.msk.bf16.vlgmr.msrb.gmra.mxu1 %vm242_vm0, %v488_v0 }
  0xe5   : > { %v623_v48 = vpop.permute.xlu0 %622 }
  0xf2   : > { %772 = vmatmul.msk.bf16.vlgmr.msra.gmra.mxu0 %vm242_vm0, %v576_v1  ;;  %773 = vmatmul.msk.bf16.vlgmr.msra.gmra.mxu1 %vm242_vm0, %v576_v1 }
 0x12f   : > { %v255_v6 = vpop.f32.mrf.mxu0  ;;  %v268_v7 = vpop.f32.mrf.mxu1 }
 0x130   : > { %v295_v26 = vadd.f32 %v294_v2, %v255_v6  ;;  %v308_v27 = vadd.f32 %v307_v3, %v268_v7 }
 0x137   : > { %v257_v8 = vpop.f32.mrf.mxu0  ;;  %v270_v9 = vpop.f32.mrf.mxu1 }
 0x13c   : > { %v393_v10 = vpop.f32.mrf.mxu3 }
 0x13d   : > { %v380_v11 = vpop.f32.mrf.mxu2 }
 0x13f   : > { %v336_v12 = vpop.f32.mrf.mxu0  ;;  %v349_v13 = vpop.f32.mrf.mxu1 }
 0x140   : > { %v353_v30 = vadd.f32 %v336_v12, %v295_v26  ;;  %v354_v31 = vadd.f32 %v349_v13, %v308_v27 }
 0x142   : > { %v397_v34 = vadd.f32 %v380_v11, %v353_v30  ;;  %v398_v35 = vadd.f32 %v393_v10, %v354_v31 }
 0x144   : > { %v395_v14 = vpop.f32.mrf.mxu3 }
 0x145   : > { %v382_v15 = vpop.f32.mrf.mxu2 }
 0x147   : > { %v338_v16 = vpop.f32.mrf.mxu0  ;;  %v351_v17 = vpop.f32.mrf.mxu1 }
 0x14c   : > { %v481_v18 = vpop.f32.mrf.mxu3 }
 0x14d   : > { %v468_v19 = vpop.f32.mrf.mxu2 }
 0x14f   : > { %v424_v20 = vpop.f32.mrf.mxu0  ;;  %v437_v21 = vpop.f32.mrf.mxu1 }
 0x150   : > { %v441_v36 = vadd.f32 %v424_v20, %v397_v34  ;;  %v442_v37 = vadd.f32 %v437_v21, %v398_v35 }
 0x152   : > { %v485_v42 = vadd.f32 %v468_v19, %v441_v36  ;;  %v486_v43 = vadd.f32 %v481_v18, %v442_v37 }
 0x154   : > { %v483_v22 = vpop.f32.mrf.mxu3 }
 0x155   : > { %v470_v23 = vpop.f32.mrf.mxu2 }
 0x157   : > { %v426_v24 = vpop.f32.mrf.mxu0  ;;  %v439_v25 = vpop.f32.mrf.mxu1 }
 0x15c   : > { %v569_v28 = vpop.f32.mrf.mxu3 }
 0x15d   : > { %v556_v29 = vpop.f32.mrf.mxu2 }
 0x15f   : > { %v512_v32 = vpop.f32.mrf.mxu0  ;;  %v525_v33 = vpop.f32.mrf.mxu1 }
 0x160   : > { %v529_v44 = vadd.f32 %v512_v32, %v485_v42  ;;  %v530_v45 = vadd.f32 %v525_v33, %v486_v43 }
 0x162   : > { %v573_v46 = vadd.f32 %v556_v29, %v529_v44  ;;  %v574_v47 = vadd.f32 %v569_v28, %v530_v45 }
 0x164   : > { %v571_v38 = vpop.f32.mrf.mxu3 }
 0x165   : > { %v558_v39 = vpop.f32.mrf.mxu2 }
 0x167   : > { %v514_v40 = vpop.f32.mrf.mxu0  ;;  %v527_v41 = vpop.f32.mrf.mxu1 }
 0x16f   : > { %v600_v49 = vpop.f32.mrf.mxu0  ;;  %v613_v50 = vpop.f32.mrf.mxu1 }
 0x170   : > { %v617_v51 = vadd.f32 %v600_v49, %v573_v46  ;;  %v618_v52 = vadd.f32 %v613_v50, %v574_v47 }
 0x172   : > { %v625_v53 = vadd.f32 %v623_v48, %v617_v51  ;;  %v626_v54 = vadd.f32 %v623_v48, %v618_v52 }
 0x174   : > { %v627_v55 = vmax.f32 %v625_v53, 0.0  ;;  %v628_v56 = vmax.f32 %v626_v54, 0.0 }
 0x176   : > { %629 = vst [vmem:[%s207_s21] sm:$0xff] %v627_v55 }
 0x177   : > { %630 = vst [vmem:[%s207_s21 + $0x8] sm:$0xff] %v628_v56  ;;  %v602_v57 = vpop.f32.mrf.mxu0  ;;  %v615_v58 = vpop.f32.mrf.mxu1 }
 0x178   : > { %946 = shalt.err (!%p943_p10)
}
 0x179   : > { %794 = dma.vmem_to_hbm [thread:$0]  (%p1092_p7), %s646_s25, 256, %s648_s18, %s632_s16  }
 0x17a PF: > { %s659_s10 = sand.u32 1, %s977_s12   ;;  %p1206_p12 = scmp.ge.s32.totalorder %s989_s15, 2 }
 0x17b   : > { %s660_s29 = scalar_lea.sflag [#allocation4], %s659_s10 }
 0x17c   : > { %p805_p13 = pnand %p1206_p12, %p1060_p6 }
 0x17e   : > { %p806_p0 = pneg %p805_p13 }
 0x180   : > { %972 = dma.done.wait (%p806_p0), %s660_s29, 256  }
 0x181   : > { %974 = vsyncadd (%p806_p0), %s660_s29, 4294967040  ;;  %p17_p3 = scmp.ge.s32.totalorder %s1078_s26, 4   ;;  %s1207_s12 = smov %s981_s13 }
 0x182   : > { %s1208_s13 = smov %s985_s14  ;;  %s1209_s14 = smov %s1088_s4 }
 0x183   : > { %s1210_s15 = smov %s1078_s26  ;;  %19 = sbr.rel (!%p17_p3) target bundleno = 6 (0x6), region = 89 }
 0x188   :  { %666 = vsyncpa [#allocation3], 1 }
 0x189   :  { %668 = vsyncpa [#allocation3 + $0x1], 1 }
 0x18a   :  { %669 = vsyncpa [#allocation6], 1 }
 0x18b   :  { %670 = vsyncpa [#allocation4], 1 }
 0x18c   :  { %672 = vsyncpa [#allocation4 + $0x1], 1 }

</bundles_post_ra>
